<compile_context>
chip_gen: v7x
topology: tpu7x:2x2x1
jax: 0.10.0
libtpu: 0.0.40
codegen_flags: <defaults>
</compile_context>

<pallas_src>
from functools import partial

import jax
import jax.numpy as jnp
from jax.experimental import pallas as pl
from jax.experimental.pallas import tpu as pltpu


def _fused_decoder_kernel(x_ref, w1_ref, w2_ref, mask_ref, o_ref, *, offsets):
    """One image per grid step.

    x_ref:    (1, Cin, FLAT)  zero-padded image, (Hp*Wp) flattened on lanes
    w1_ref:   (9, C1, Cin)    conv_1 weights, tap-major, (Cout, Cin) per tap
    w2_ref:   (9, C2, C1)     conv_2 weights
    mask_ref: (1, FLAT)       1.0 at interior (valid) positions, else 0.0
    o_ref:    (1, C2, FLAT)   conv_2 output in padded-flat coordinates
    """
    flat = x_ref.shape[-1]

    def shift(v, d):
        # s[:, p] = v[:, (p + d) % flat].  Wrap-around only affects positions
        # outside the valid interior, which are masked / cropped away.
        if d == 0:
            return v
        return pltpu.roll(v, shift=(-d) % flat, axis=1)

    def conv(v, w_ref):
        cout = w_ref.shape[1]
        acc = jnp.zeros((cout, flat), jnp.float32)
        for t, d in enumerate(offsets):
            acc += jnp.dot(w_ref[t], shift(v, d),
                           preferred_element_type=jnp.float32)
        return acc

    x = x_ref[0].astype(jnp.float32)                          # (Cin, FLAT)
    # ReLU, then zero the padding ring / lane tail so conv2 sees zero padding.
    h = jnp.maximum(conv(x, w1_ref), 0.0) * mask_ref[...]     # (C1, FLAT)
    o_ref[0] = conv(h, w2_ref).astype(o_ref.dtype)


def decoder_forward_pallas(x_nchw, w1_oihw, w2_oihw):
    """rec = conv2(relu(conv1(x))); both convs 3x3, stride 1, pad 1, no bias."""
    N, cin, H, W = x_nchw.shape
    c1 = w1_oihw.shape[0]
    c2 = w2_oihw.shape[0]
    Hp, Wp = H + 2, W + 2
    flat_valid = Hp * Wp
    flat = ((flat_valid + 127) // 128) * 128      # lane-pad to multiple of 128

    # zero-pad spatially, flatten (Hp, Wp) onto the lane axis, pad lane tail.
    x_pad = jnp.pad(x_nchw, ((0, 0), (0, 0), (1, 1), (1, 1)))
    x_flat = jnp.pad(x_pad.reshape(N, cin, flat_valid),
                     ((0, 0), (0, 0), (0, flat - flat_valid)))

    # (O, I, kh, kw) -> (kh*kw, O, I): tap-major, matmul-ready (Cout, Cin).
    w1 = jnp.transpose(w1_oihw, (2, 3, 0, 1)).reshape(9, c1, cin)
    w2 = jnp.transpose(w2_oihw, (2, 3, 0, 1)).reshape(9, c2, c1)

    # Interior mask (valid conv-output positions) in padded-flat coordinates.
    p = jnp.arange(flat)
    row, col = p // Wp, p % Wp
    interior = ((row >= 1) & (row <= H) & (col >= 1) & (col <= W)
                & (p < flat_valid))
    mask = interior.astype(x_nchw.dtype).reshape(1, flat)

    # Flat-index offset of each 3x3 tap (tap index t = ky*3 + kx).
    offsets = tuple((ky - 1) * Wp + (kx - 1)
                    for ky in range(3) for kx in range(3))

    out_flat = pl.pallas_call(
        partial(_fused_decoder_kernel, offsets=offsets),
        out_shape=jax.ShapeDtypeStruct((N, c2, flat), x_nchw.dtype),
        grid_spec=pltpu.PrefetchScalarGridSpec(
            num_scalar_prefetch=0,
            grid=(N,),
            in_specs=[
                pl.BlockSpec((1, cin, flat), lambda n: (n, 0, 0)),
                pl.BlockSpec((9, c1, cin), lambda n: (0, 0, 0)),
                pl.BlockSpec((9, c2, c1), lambda n: (0, 0, 0)),
                pl.BlockSpec((1, flat), lambda n: (0, 0)),
            ],
            out_specs=pl.BlockSpec((1, c2, flat), lambda n: (n, 0, 0)),
        ),
        compiler_params=pltpu.CompilerParams(
            dimension_semantics=("parallel",)),
    )(x_flat, w1, w2, mask)

    # Drop lane padding, unflatten, crop the halo -> NCHW output directly.
    out = out_flat[:, :, :flat_valid].reshape(N, c2, Hp, Wp)
    return out[:, :, 1:H + 1, 1:W + 1]


decoder_forward = jax.jit(decoder_forward_pallas)


def xavier_uniform_conv(key, cout, cin, k):
    """Matches nn.init.xavier_uniform_ for a (cout, cin, k, k) conv weight."""
    fan_in = cin * k * k
    fan_out = cout * k * k
    bound = (6.0 / (fan_in + fan_out)) ** 0.5
    return jax.random.uniform(key, (cout, cin, k, k), jnp.float32,
                              minval=-bound, maxval=bound)


def _reference(x_nchw, w1_oihw, w2_oihw):
    """Pure-JAX reference (lax conv) for correctness check."""
    dn = ("NCHW", "OIHW", "NCHW")
    h = jax.lax.conv_general_dilated(x_nchw, w1_oihw, (1, 1), "SAME",
                                     dimension_numbers=dn)
    h = jnp.maximum(h, 0.0)
    return jax.lax.conv_general_dilated(h, w2_oihw, (1, 1), "SAME",
                                        dimension_numbers=dn)


if __name__ == "__main__":
    # decoder(in_channel=4, channel_fea=8): input has filters*2 = 16 channels.
    in_channel = 4
    channel_fea = 8
    N, H, W = 2, 16, 16

    key = jax.random.PRNGKey(0)
    kx, k1, k2 = jax.random.split(key, 3)

    x = jax.random.normal(kx, (N, channel_fea * 2, H, W), jnp.float32)
    w1 = xavier_uniform_conv(k1, channel_fea, channel_fea * 2, 3)   # conv_1
    w2 = xavier_uniform_conv(k2, in_channel, channel_fea, 3)        # conv_2

    out = jax.block_until_ready(decoder_forward(x, w1, w2))

    ref = _reference(x, w1, w2)
    assert out.shape == (N, in_channel, H, W)
    assert jnp.allclose(out, ref, atol=1e-4, rtol=1e-4)

    print("KERNEL_OK")
</pallas_src>

<mosaic_0001>
module attributes {stable_mosaic.version = 11 : i64} {
  func.func @_fused_decoder_kernel(%arg0: i32, %arg1: memref<1x16x384xf32, #tpu.memory_space<vmem>>, %arg2: memref<9x8x16xf32, #tpu.memory_space<vmem>>, %arg3: memref<9x4x8xf32, #tpu.memory_space<vmem>>, %arg4: memref<1x384xf32, #tpu.memory_space<vmem>>, %arg5: memref<1x4x384xf32, #tpu.memory_space<vmem>>) attributes {dimension_semantics = [#tpu.dimension_semantics<parallel>], iteration_bounds = array<i64: 2>, scalar_prefetch = 0 : i64, scratch_operands = 0 : i64, tpu.core_type = #tpu.core_type<tc>, window_params = [{transform_indices = @transform_0, window_bounds = array<i64: 1, 16, 384>}, {pipeline_mode = #tpu.pipeline_mode<synchronous>, transform_indices = @transform_1, window_bounds = array<i64: 9, 8, 16>}, {pipeline_mode = #tpu.pipeline_mode<synchronous>, transform_indices = @transform_2, window_bounds = array<i64: 9, 4, 8>}, {pipeline_mode = #tpu.pipeline_mode<synchronous>, transform_indices = @transform_3, window_bounds = array<i64: 1, 384>}, {transform_indices = @transform_4, window_bounds = array<i64: 1, 4, 384>}]} {
    %c0 = arith.constant 0 : index
    %c0_0 = arith.constant 0 : index
    %c0_1 = arith.constant 0 : index
    %0 = vector.load %arg1[%c0, %c0_0, %c0_1] : memref<1x16x384xf32, #tpu.memory_space<vmem>>, vector<1x16x384xf32>
    %1 = vector.shape_cast %0 : vector<1x16x384xf32> to vector<16x384xf32>
    %cst = arith.constant 0.000000e+00 : f32
    %2 = vector.broadcast %cst : f32 to vector<8x384xf32>
    %c0_2 = arith.constant 0 : index
    %c0_3 = arith.constant 0 : index
    %c0_4 = arith.constant 0 : index
    %3 = vector.load %arg2[%c0_2, %c0_3, %c0_4] : memref<9x8x16xf32, #tpu.memory_space<vmem>>, vector<1x8x16xf32>
    %4 = vector.shape_cast %3 : vector<1x8x16xf32> to vector<8x16xf32>
    %c19_i32 = arith.constant 19 : i32
    %5 = tpu.dynamic_rotate %1 by %c19_i32 dim 1 : vector<16x384xf32>, i32 -> vector<16x384xf32>
    %cst_5 = arith.constant dense<0.000000e+00> : vector<8x384xf32>
    %6 = tpu.matmul %4, %5, %cst_5 {dimension_numbers = #tpu.dot_dimension_numbers<[1], [0], [0], [1], [0, 0, 1, 1], [], []>} : vector<8x16xf32>, vector<16x384xf32>, vector<8x384xf32> -> vector<8x384xf32>
    %7 = arith.addf %2, %6 : vector<8x384xf32>
    %c1 = arith.constant 1 : index
    %c0_6 = arith.constant 0 : index
    %c0_7 = arith.constant 0 : index
    %8 = vector.load %arg2[%c1, %c0_6, %c0_7] : memref<9x8x16xf32, #tpu.memory_space<vmem>>, vector<1x8x16xf32>
    %9 = vector.shape_cast %8 : vector<1x8x16xf32> to vector<8x16xf32>
    %c18_i32 = arith.constant 18 : i32
    %10 = tpu.dynamic_rotate %1 by %c18_i32 dim 1 : vector<16x384xf32>, i32 -> vector<16x384xf32>
    %cst_8 = arith.constant dense<0.000000e+00> : vector<8x384xf32>
    %11 = tpu.matmul %9, %10, %cst_8 {dimension_numbers = #tpu.dot_dimension_numbers<[1], [0], [0], [1], [0, 0, 1, 1], [], []>} : vector<8x16xf32>, vector<16x384xf32>, vector<8x384xf32> -> vector<8x384xf32>
    %12 = arith.addf %7, %11 : vector<8x384xf32>
    %c2 = arith.constant 2 : index
    %c0_9 = arith.constant 0 : index
    %c0_10 = arith.constant 0 : index
    %13 = vector.load %arg2[%c2, %c0_9, %c0_10] : memref<9x8x16xf32, #tpu.memory_space<vmem>>, vector<1x8x16xf32>
    %14 = vector.shape_cast %13 : vector<1x8x16xf32> to vector<8x16xf32>
    %c17_i32 = arith.constant 17 : i32
    %15 = tpu.dynamic_rotate %1 by %c17_i32 dim 1 : vector<16x384xf32>, i32 -> vector<16x384xf32>
    %cst_11 = arith.constant dense<0.000000e+00> : vector<8x384xf32>
    %16 = tpu.matmul %14, %15, %cst_11 {dimension_numbers = #tpu.dot_dimension_numbers<[1], [0], [0], [1], [0, 0, 1, 1], [], []>} : vector<8x16xf32>, vector<16x384xf32>, vector<8x384xf32> -> vector<8x384xf32>
    %17 = arith.addf %12, %16 : vector<8x384xf32>
    %c3 = arith.constant 3 : index
    %c0_12 = arith.constant 0 : index
    %c0_13 = arith.constant 0 : index
    %18 = vector.load %arg2[%c3, %c0_12, %c0_13] : memref<9x8x16xf32, #tpu.memory_space<vmem>>, vector<1x8x16xf32>
    %19 = vector.shape_cast %18 : vector<1x8x16xf32> to vector<8x16xf32>
    %c1_i32 = arith.constant 1 : i32
    %20 = tpu.dynamic_rotate %1 by %c1_i32 dim 1 : vector<16x384xf32>, i32 -> vector<16x384xf32>
    %cst_14 = arith.constant dense<0.000000e+00> : vector<8x384xf32>
    %21 = tpu.matmul %19, %20, %cst_14 {dimension_numbers = #tpu.dot_dimension_numbers<[1], [0], [0], [1], [0, 0, 1, 1], [], []>} : vector<8x16xf32>, vector<16x384xf32>, vector<8x384xf32> -> vector<8x384xf32>
    %22 = arith.addf %17, %21 : vector<8x384xf32>
    %c4 = arith.constant 4 : index
    %c0_15 = arith.constant 0 : index
    %c0_16 = arith.constant 0 : index
    %23 = vector.load %arg2[%c4, %c0_15, %c0_16] : memref<9x8x16xf32, #tpu.memory_space<vmem>>, vector<1x8x16xf32>
    %24 = vector.shape_cast %23 : vector<1x8x16xf32> to vector<8x16xf32>
    %cst_17 = arith.constant dense<0.000000e+00> : vector<8x384xf32>
    %25 = tpu.matmul %24, %1, %cst_17 {dimension_numbers = #tpu.dot_dimension_numbers<[1], [0], [0], [1], [0, 0, 1, 1], [], []>} : vector<8x16xf32>, vector<16x384xf32>, vector<8x384xf32> -> vector<8x384xf32>
    %26 = arith.addf %22, %25 : vector<8x384xf32>
    %c5 = arith.constant 5 : index
    %c0_18 = arith.constant 0 : index
    %c0_19 = arith.constant 0 : index
    %27 = vector.load %arg2[%c5, %c0_18, %c0_19] : memref<9x8x16xf32, #tpu.memory_space<vmem>>, vector<1x8x16xf32>
    %28 = vector.shape_cast %27 : vector<1x8x16xf32> to vector<8x16xf32>
    %c383_i32 = arith.constant 383 : i32
    %29 = tpu.dynamic_rotate %1 by %c383_i32 dim 1 : vector<16x384xf32>, i32 -> vector<16x384xf32>
    %cst_20 = arith.constant dense<0.000000e+00> : vector<8x384xf32>
    %30 = tpu.matmul %28, %29, %cst_20 {dimension_numbers = #tpu.dot_dimension_numbers<[1], [0], [0], [1], [0, 0, 1, 1], [], []>} : vector<8x16xf32>, vector<16x384xf32>, vector<8x384xf32> -> vector<8x384xf32>
    %31 = arith.addf %26, %30 : vector<8x384xf32>
    %c6 = arith.constant 6 : index
    %c0_21 = arith.constant 0 : index
    %c0_22 = arith.constant 0 : index
    %32 = vector.load %arg2[%c6, %c0_21, %c0_22] : memref<9x8x16xf32, #tpu.memory_space<vmem>>, vector<1x8x16xf32>
    %33 = vector.shape_cast %32 : vector<1x8x16xf32> to vector<8x16xf32>
    %c367_i32 = arith.constant 367 : i32
    %34 = tpu.dynamic_rotate %1 by %c367_i32 dim 1 : vector<16x384xf32>, i32 -> vector<16x384xf32>
    %cst_23 = arith.constant dense<0.000000e+00> : vector<8x384xf32>
    %35 = tpu.matmul %33, %34, %cst_23 {dimension_numbers = #tpu.dot_dimension_numbers<[1], [0], [0], [1], [0, 0, 1, 1], [], []>} : vector<8x16xf32>, vector<16x384xf32>, vector<8x384xf32> -> vector<8x384xf32>
    %36 = arith.addf %31, %35 : vector<8x384xf32>
    %c7 = arith.constant 7 : index
    %c0_24 = arith.constant 0 : index
    %c0_25 = arith.constant 0 : index
    %37 = vector.load %arg2[%c7, %c0_24, %c0_25] : memref<9x8x16xf32, #tpu.memory_space<vmem>>, vector<1x8x16xf32>
    %38 = vector.shape_cast %37 : vector<1x8x16xf32> to vector<8x16xf32>
    %c366_i32 = arith.constant 366 : i32
    %39 = tpu.dynamic_rotate %1 by %c366_i32 dim 1 : vector<16x384xf32>, i32 -> vector<16x384xf32>
    %cst_26 = arith.constant dense<0.000000e+00> : vector<8x384xf32>
    %40 = tpu.matmul %38, %39, %cst_26 {dimension_numbers = #tpu.dot_dimension_numbers<[1], [0], [0], [1], [0, 0, 1, 1], [], []>} : vector<8x16xf32>, vector<16x384xf32>, vector<8x384xf32> -> vector<8x384xf32>
    %41 = arith.addf %36, %40 : vector<8x384xf32>
    %c8 = arith.constant 8 : index
    %c0_27 = arith.constant 0 : index
    %c0_28 = arith.constant 0 : index
    %42 = vector.load %arg2[%c8, %c0_27, %c0_28] : memref<9x8x16xf32, #tpu.memory_space<vmem>>, vector<1x8x16xf32>
    %43 = vector.shape_cast %42 : vector<1x8x16xf32> to vector<8x16xf32>
    %c365_i32 = arith.constant 365 : i32
    %44 = tpu.dynamic_rotate %1 by %c365_i32 dim 1 : vector<16x384xf32>, i32 -> vector<16x384xf32>
    %cst_29 = arith.constant dense<0.000000e+00> : vector<8x384xf32>
    %45 = tpu.matmul %43, %44, %cst_29 {dimension_numbers = #tpu.dot_dimension_numbers<[1], [0], [0], [1], [0, 0, 1, 1], [], []>} : vector<8x16xf32>, vector<16x384xf32>, vector<8x384xf32> -> vector<8x384xf32>
    %46 = arith.addf %41, %45 : vector<8x384xf32>
    %cst_30 = arith.constant 0.000000e+00 : f32
    %47 = vector.broadcast %cst_30 : f32 to vector<8x384xf32>
    %48 = arith.maximumf %46, %47 : vector<8x384xf32>
    %c0_31 = arith.constant 0 : index
    %c0_32 = arith.constant 0 : index
    %49 = vector.load %arg4[%c0_31, %c0_32] : memref<1x384xf32, #tpu.memory_space<vmem>>, vector<1x384xf32>
    %50 = vector.broadcast %49 : vector<1x384xf32> to vector<8x384xf32>
    %51 = arith.mulf %48, %50 : vector<8x384xf32>
    %cst_33 = arith.constant 0.000000e+00 : f32
    %52 = vector.broadcast %cst_33 : f32 to vector<4x384xf32>
    %c0_34 = arith.constant 0 : index
    %c0_35 = arith.constant 0 : index
    %c0_36 = arith.constant 0 : index
    %53 = vector.load %arg3[%c0_34, %c0_35, %c0_36] : memref<9x4x8xf32, #tpu.memory_space<vmem>>, vector<1x4x8xf32>
    %54 = vector.shape_cast %53 : vector<1x4x8xf32> to vector<4x8xf32>
    %c19_i32_37 = arith.constant 19 : i32
    %55 = tpu.dynamic_rotate %51 by %c19_i32_37 dim 1 : vector<8x384xf32>, i32 -> vector<8x384xf32>
    %cst_38 = arith.constant dense<0.000000e+00> : vector<4x384xf32>
    %56 = tpu.matmul %54, %55, %cst_38 {dimension_numbers = #tpu.dot_dimension_numbers<[1], [0], [0], [1], [0, 0, 1, 1], [], []>} : vector<4x8xf32>, vector<8x384xf32>, vector<4x384xf32> -> vector<4x384xf32>
    %57 = arith.addf %52, %56 : vector<4x384xf32>
    %c1_39 = arith.constant 1 : index
    %c0_40 = arith.constant 0 : index
    %c0_41 = arith.constant 0 : index
    %58 = vector.load %arg3[%c1_39, %c0_40, %c0_41] : memref<9x4x8xf32, #tpu.memory_space<vmem>>, vector<1x4x8xf32>
    %59 = vector.shape_cast %58 : vector<1x4x8xf32> to vector<4x8xf32>
    %c18_i32_42 = arith.constant 18 : i32
    %60 = tpu.dynamic_rotate %51 by %c18_i32_42 dim 1 : vector<8x384xf32>, i32 -> vector<8x384xf32>
    %cst_43 = arith.constant dense<0.000000e+00> : vector<4x384xf32>
    %61 = tpu.matmul %59, %60, %cst_43 {dimension_numbers = #tpu.dot_dimension_numbers<[1], [0], [0], [1], [0, 0, 1, 1], [], []>} : vector<4x8xf32>, vector<8x384xf32>, vector<4x384xf32> -> vector<4x384xf32>
    %62 = arith.addf %57, %61 : vector<4x384xf32>
    %c2_44 = arith.constant 2 : index
    %c0_45 = arith.constant 0 : index
    %c0_46 = arith.constant 0 : index
    %63 = vector.load %arg3[%c2_44, %c0_45, %c0_46] : memref<9x4x8xf32, #tpu.memory_space<vmem>>, vector<1x4x8xf32>
    %64 = vector.shape_cast %63 : vector<1x4x8xf32> to vector<4x8xf32>
    %c17_i32_47 = arith.constant 17 : i32
    %65 = tpu.dynamic_rotate %51 by %c17_i32_47 dim 1 : vector<8x384xf32>, i32 -> vector<8x384xf32>
    %cst_48 = arith.constant dense<0.000000e+00> : vector<4x384xf32>
    %66 = tpu.matmul %64, %65, %cst_48 {dimension_numbers = #tpu.dot_dimension_numbers<[1], [0], [0], [1], [0, 0, 1, 1], [], []>} : vector<4x8xf32>, vector<8x384xf32>, vector<4x384xf32> -> vector<4x384xf32>
    %67 = arith.addf %62, %66 : vector<4x384xf32>
    %c3_49 = arith.constant 3 : index
    %c0_50 = arith.constant 0 : index
    %c0_51 = arith.constant 0 : index
    %68 = vector.load %arg3[%c3_49, %c0_50, %c0_51] : memref<9x4x8xf32, #tpu.memory_space<vmem>>, vector<1x4x8xf32>
    %69 = vector.shape_cast %68 : vector<1x4x8xf32> to vector<4x8xf32>
    %c1_i32_52 = arith.constant 1 : i32
    %70 = tpu.dynamic_rotate %51 by %c1_i32_52 dim 1 : vector<8x384xf32>, i32 -> vector<8x384xf32>
    %cst_53 = arith.constant dense<0.000000e+00> : vector<4x384xf32>
    %71 = tpu.matmul %69, %70, %cst_53 {dimension_numbers = #tpu.dot_dimension_numbers<[1], [0], [0], [1], [0, 0, 1, 1], [], []>} : vector<4x8xf32>, vector<8x384xf32>, vector<4x384xf32> -> vector<4x384xf32>
    %72 = arith.addf %67, %71 : vector<4x384xf32>
    %c4_54 = arith.constant 4 : index
    %c0_55 = arith.constant 0 : index
    %c0_56 = arith.constant 0 : index
    %73 = vector.load %arg3[%c4_54, %c0_55, %c0_56] : memref<9x4x8xf32, #tpu.memory_space<vmem>>, vector<1x4x8xf32>
    %74 = vector.shape_cast %73 : vector<1x4x8xf32> to vector<4x8xf32>
    %cst_57 = arith.constant dense<0.000000e+00> : vector<4x384xf32>
    %75 = tpu.matmul %74, %51, %cst_57 {dimension_numbers = #tpu.dot_dimension_numbers<[1], [0], [0], [1], [0, 0, 1, 1], [], []>} : vector<4x8xf32>, vector<8x384xf32>, vector<4x384xf32> -> vector<4x384xf32>
    %76 = arith.addf %72, %75 : vector<4x384xf32>
    %c5_58 = arith.constant 5 : index
    %c0_59 = arith.constant 0 : index
    %c0_60 = arith.constant 0 : index
    %77 = vector.load %arg3[%c5_58, %c0_59, %c0_60] : memref<9x4x8xf32, #tpu.memory_space<vmem>>, vector<1x4x8xf32>
    %78 = vector.shape_cast %77 : vector<1x4x8xf32> to vector<4x8xf32>
    %c383_i32_61 = arith.constant 383 : i32
    %79 = tpu.dynamic_rotate %51 by %c383_i32_61 dim 1 : vector<8x384xf32>, i32 -> vector<8x384xf32>
    %cst_62 = arith.constant dense<0.000000e+00> : vector<4x384xf32>
    %80 = tpu.matmul %78, %79, %cst_62 {dimension_numbers = #tpu.dot_dimension_numbers<[1], [0], [0], [1], [0, 0, 1, 1], [], []>} : vector<4x8xf32>, vector<8x384xf32>, vector<4x384xf32> -> vector<4x384xf32>
    %81 = arith.addf %76, %80 : vector<4x384xf32>
    %c6_63 = arith.constant 6 : index
    %c0_64 = arith.constant 0 : index
    %c0_65 = arith.constant 0 : index
    %82 = vector.load %arg3[%c6_63, %c0_64, %c0_65] : memref<9x4x8xf32, #tpu.memory_space<vmem>>, vector<1x4x8xf32>
    %83 = vector.shape_cast %82 : vector<1x4x8xf32> to vector<4x8xf32>
    %c367_i32_66 = arith.constant 367 : i32
    %84 = tpu.dynamic_rotate %51 by %c367_i32_66 dim 1 : vector<8x384xf32>, i32 -> vector<8x384xf32>
    %cst_67 = arith.constant dense<0.000000e+00> : vector<4x384xf32>
    %85 = tpu.matmul %83, %84, %cst_67 {dimension_numbers = #tpu.dot_dimension_numbers<[1], [0], [0], [1], [0, 0, 1, 1], [], []>} : vector<4x8xf32>, vector<8x384xf32>, vector<4x384xf32> -> vector<4x384xf32>
    %86 = arith.addf %81, %85 : vector<4x384xf32>
    %c7_68 = arith.constant 7 : index
    %c0_69 = arith.constant 0 : index
    %c0_70 = arith.constant 0 : index
    %87 = vector.load %arg3[%c7_68, %c0_69, %c0_70] : memref<9x4x8xf32, #tpu.memory_space<vmem>>, vector<1x4x8xf32>
    %88 = vector.shape_cast %87 : vector<1x4x8xf32> to vector<4x8xf32>
    %c366_i32_71 = arith.constant 366 : i32
    %89 = tpu.dynamic_rotate %51 by %c366_i32_71 dim 1 : vector<8x384xf32>, i32 -> vector<8x384xf32>
    %cst_72 = arith.constant dense<0.000000e+00> : vector<4x384xf32>
    %90 = tpu.matmul %88, %89, %cst_72 {dimension_numbers = #tpu.dot_dimension_numbers<[1], [0], [0], [1], [0, 0, 1, 1], [], []>} : vector<4x8xf32>, vector<8x384xf32>, vector<4x384xf32> -> vector<4x384xf32>
    %91 = arith.addf %86, %90 : vector<4x384xf32>
    %c8_73 = arith.constant 8 : index
    %c0_74 = arith.constant 0 : index
    %c0_75 = arith.constant 0 : index
    %92 = vector.load %arg3[%c8_73, %c0_74, %c0_75] : memref<9x4x8xf32, #tpu.memory_space<vmem>>, vector<1x4x8xf32>
    %93 = vector.shape_cast %92 : vector<1x4x8xf32> to vector<4x8xf32>
    %c365_i32_76 = arith.constant 365 : i32
    %94 = tpu.dynamic_rotate %51 by %c365_i32_76 dim 1 : vector<8x384xf32>, i32 -> vector<8x384xf32>
    %cst_77 = arith.constant dense<0.000000e+00> : vector<4x384xf32>
    %95 = tpu.matmul %93, %94, %cst_77 {dimension_numbers = #tpu.dot_dimension_numbers<[1], [0], [0], [1], [0, 0, 1, 1], [], []>} : vector<4x8xf32>, vector<8x384xf32>, vector<4x384xf32> -> vector<4x384xf32>
    %96 = arith.addf %91, %95 : vector<4x384xf32>
    %c0_78 = arith.constant 0 : index
    %c0_79 = arith.constant 0 : index
    %c0_80 = arith.constant 0 : index
    %97 = vector.load %arg5[%c0_78, %c0_79, %c0_80] : memref<1x4x384xf32, #tpu.memory_space<vmem>>, vector<1x4x384xf32>
    %98 = vector.shape_cast %97 : vector<1x4x384xf32> to vector<4x384xf32>
    %99 = vector.shape_cast %96 : vector<4x384xf32> to vector<1x4x384xf32>
    tpu.vector_store %arg5[%c0_78, %c0_79, %c0_80], %99 {strides = array<i32>} : memref<1x4x384xf32, #tpu.memory_space<vmem>>, vector<1x4x384xf32>,
    return
  }
  func.func @transform_0(%arg0: i32) -> (i32, i32, i32) {
    %c0_i32 = arith.constant 0 : i32
    %c0_i32_0 = arith.constant 0 : i32
    %c0_i32_1 = arith.constant 0 : i32
    return %arg0, %c0_i32, %c0_i32_0 : i32, i32, i32
  }
  func.func @transform_1(%arg0: i32) -> (i32, i32, i32) {
    %c0_i32 = arith.constant 0 : i32
    %c0_i32_0 = arith.constant 0 : i32
    %c0_i32_1 = arith.constant 0 : i32
    %c0_i32_2 = arith.constant 0 : i32
    return %c0_i32, %c0_i32_0, %c0_i32_1 : i32, i32, i32
  }
  func.func @transform_2(%arg0: i32) -> (i32, i32, i32) {
    %c0_i32 = arith.constant 0 : i32
    %c0_i32_0 = arith.constant 0 : i32
    %c0_i32_1 = arith.constant 0 : i32
    %c0_i32_2 = arith.constant 0 : i32
    return %c0_i32, %c0_i32_0, %c0_i32_1 : i32, i32, i32
  }
  func.func @transform_3(%arg0: i32) -> (i32, i32) {
    %c0_i32 = arith.constant 0 : i32
    %c0_i32_0 = arith.constant 0 : i32
    %c0_i32_1 = arith.constant 0 : i32
    return %c0_i32, %c0_i32_0 : i32, i32
  }
  func.func @transform_4(%arg0: i32) -> (i32, i32, i32) {
    %c0_i32 = arith.constant 0 : i32
    %c0_i32_0 = arith.constant 0 : i32
    %c0_i32_1 = arith.constant 0 : i32
    return %arg0, %c0_i32, %c0_i32_0 : i32, i32, i32
  }
}

</mosaic_0001>

<bundles_post_ra>
// kernel: decoder_forward_pallas.1
= control target key start
LH: loop header
LB: loop body
LE: loop exit
PB: predicated region body
PF: predicated region fallthrough
CT: control target
= control target key end

     0   :  { %s3710_s15 = smov 0   ;;  %s4166_s0 = inlined_call_operand.vmem [shape: f32[2,16,384], index: 0, kind: input, shape index: {}]   ;;  %s4167_s1 = inlined_call_operand.vmem [shape: f32[9,8,16], index: 1, kind: input, shape index: {}]   ;;  %s4168_s2 = inlined_call_operand.vmem [shape: f32[9,4,8], index: 2, kind: input, shape index: {}]   ;;  %s4169_s3 = inlined_call_operand.vmem [shape: f32[1,384], index: 3, kind: input, shape index: {}]   ;;  %s4170_s4 = inlined_call_operand.vmem [shape: f32[2,4,384], index: 4, kind: output, shape index: {}]  }
   0x1 LB: > { %s3184_s16 = sadd.s32 4294967295, %s3672_s15   ;;  %p3188_p0 = scmp.ge.s32.totalorder %s3672_s15, 1  ;;  %s3672_s15 = sphi %s3710_s15, %s14_s15  }
   0x2   : > { %p162_p1 = scmp.lt.s32.totalorder %s3672_s15, 3 }
   0x4   : > { %p163_p2 = pnand %p3188_p0, %p162_p1 }
   0x5   : > { %p188_p3 = scmp.lt.s32.totalorder (!%p163_p2), %s3184_s16, 1  ;;  %v3674_v0 = vmov (!%p163_p2), 0.0|0.0   ;;  %s3675_s21 = smov (!%p163_p2), 18   ;;  %vm3677_vm0 = vmmov (!%p163_p2), 0   ;;  %v3678_v10 = vmov (!%p163_p2), 0.0   ;;  %v217_v14 = vlaneseq (!%p163_p2)  ;;  %v3191_v45 = vld [vmem:[%s4167_s1 + $0x8] sm:$0xff] (!%p163_p2) }
   0x6   : > { %166 = sbr.rel (%p163_p2) target bundleno = 830 (0x33e), region = 36  ;;  %3402 = vmatprep.subr.bf16.mxu1 (!%p163_p2), %v3674_v0  ;;  %s3676_s22 = smov (!%p163_p2), 19   ;;  %3294 = vmatprep.mubr.msk.f32.mxu1 (!%p163_p2), %vm3677_vm0, %v3678_v10  ;;  %vm247_vm3 = vcmask (!%p163_p2), 130048   ;;  %vm1737_vm10 = vcmask (!%p163_p2), 64512  }
   0x7   : > { %315 = vmatprep.mubr.f32.mxu0 (!%p163_p2), %v3678_v10  ;;  %s3679_s23 = smov (!%p163_p2), 17   ;;  %s3680_s24 = smov (!%p163_p2), 1   ;;  %v3777_v16 = vand.u32 (!%p163_p2), 127, %v217_v14 }
   0x8   : > { %s3681_s25 = smov (!%p163_p2), 127   ;;  %s3682_s26 = smov (!%p163_p2), 111  }
   0x9   : > { %s3683_s27 = smov (!%p163_p2), 110   ;;  %s3684_s28 = smov (!%p163_p2), 109   ;;  %vm240_vm1 = vcmp.lt.s32.totalorder (!%p163_p2), %v3777_v16, 18  ;;  %vm219_vm2 = vcmp.lt.s32.totalorder (!%p163_p2), %v3777_v16, 19  ;;  %vm550_vm4 = vcmp.lt.s32.totalorder (!%p163_p2), %v3777_v16, 17  ;;  %vm718_vm5 = vcmp.lt.s32.totalorder (!%p163_p2), %v3777_v16, 1 }
   0xa   : > { %vm1035_vm6 = vcmp.lt.s32.totalorder (!%p163_p2), %v3777_v16, 127  ;;  %vm1203_vm7 = vcmp.lt.s32.totalorder (!%p163_p2), %v3777_v16, 111  ;;  %vm1371_vm8 = vcmp.lt.s32.totalorder (!%p163_p2), %v3777_v16, 110  ;;  %vm1539_vm9 = vcmp.lt.s32.totalorder (!%p163_p2), %v3777_v16, 109 }
   0xd   : > { %s4172_s16 = smov (!%p188_p3, %s3184_s16), 1 }
   0xe   : > { %s3525_s17 = smul.u32 48, %s4172_s16 }
   0xf   : > { %s3526_s19 = smul.u32 12, %s4172_s16 }
  0x10   : > { %s192_s20 = scalar_lea.vmem %s4166_s0, %s3525_s17 }
  0x11   : > { %v3725_v1 = vld [vmem:[%s192_s20 + $0x10] sm:$0xff]  ;;  %v3727_v2 = vld [vmem:[%s192_s20 + $0x28] sm:$0xff]  ;;  %v3729_v3 = vld [vmem:[%s192_s20] sm:$0xff]  ;;  %s197_s30 = scalar_lea.vmem %s4170_s4, %s3526_s19 }
  0x12   : > { %v3556_v4 = vpack.i.bf16 %v3727_v2, %v3725_v1  ;;  %v3733_v5 = vld [vmem:[%s192_s20 + $0x18] sm:$0xff]  ;;  %v3735_v6 = vld [vmem:[%s192_s20 + $0x8] sm:$0xff]  ;;  %v3737_v7 = vld [vmem:[%s192_s20 + $0x20] sm:$0xff]  ;;  %v3431_v13 = vpack.c.bf16 %v3727_v2, %v3725_v1 }
  0x13   : > { %v3546_v8 = vpack.i.bf16 %v3733_v5, %v3729_v3  ;;  %v3551_v9 = vpack.i.bf16 %v3737_v7, %v3735_v6  ;;  %v3426_v11 = vpack.c.bf16 %v3737_v7, %v3735_v6  ;;  %v3428_v12 = vpack.c.bf16 %v3733_v5, %v3729_v3 }
  0x14   : > { %3557 = vrot.lane.b32.xlu1 %v3556_v4, %s3675_s21 }
  0x15   : > { %3547 = vrot.lane.b32.xlu0 %v3546_v8, %s3675_s21 }
  0x18   : > { %3562 = vrot.lane.b32.xlu1 %v3546_v8, %s3676_s22 }
  0x19   : > { %3552 = vrot.lane.b32.xlu0 %v3551_v9, %s3675_s21 }
  0x1c   : > { %3572 = vrot.lane.b32.xlu1 %v3556_v4, %s3676_s22 }
  0x1d   : > { %3567 = vrot.lane.b32.xlu0 %v3551_v9, %s3676_s22 }
  0x20   : > { %3582 = vrot.lane.b32.xlu1 %v3551_v9, %s3679_s23 }
  0x21   : > { %3577 = vrot.lane.b32.xlu0 %v3546_v8, %s3679_s23 }
  0x24   : > { %3592 = vrot.lane.b32.xlu1 %v3546_v8, %s3680_s24 }
  0x25   : > { %3587 = vrot.lane.b32.xlu0 %v3556_v4, %s3679_s23 }
  0x28   : > { %3602 = vrot.lane.b32.xlu1 %v3556_v4, %s3680_s24 }
  0x29   : > { %3597 = vrot.lane.b32.xlu0 %v3551_v9, %s3680_s24 }
  0x2c   : > { %3612 = vrot.lane.b32.xlu1 %v3556_v4, %s3681_s25 }
  0x2d   : > { %3607 = vrot.lane.b32.xlu0 %v3551_v9, %s3681_s25 }
  0x30   : > { %3622 = vrot.lane.b32.xlu1 %v3551_v9, %s3682_s26 }
  0x31   : > { %3617 = vrot.lane.b32.xlu0 %v3546_v8, %s3681_s25 }
  0x34   : > { %3632 = vrot.lane.b32.xlu1 %v3546_v8, %s3682_s26 }
  0x35   : > { %3627 = vrot.lane.b32.xlu0 %v3556_v4, %s3682_s26 }
  0x38   : > { %3642 = vrot.lane.b32.xlu1 %v3556_v4, %s3683_s27 }
  0x39   : > { %3637 = vrot.lane.b32.xlu0 %v3551_v9, %s3683_s27 }
  0x3c   : > { %3652 = vrot.lane.b32.xlu1 %v3551_v9, %s3684_s28 }
  0x3d   : > { %3647 = vrot.lane.b32.xlu0 %v3546_v8, %s3683_s27 }
  0x40   : > { %3662 = vrot.lane.b32.xlu1 %v3546_v8, %s3684_s28 }
  0x41   : > { %3657 = vrot.lane.b32.xlu0 %v3556_v4, %s3684_s28 }
  0x86   : > { %v3558_v15 = vpop.permute.xlu1 %3557 }
  0x87   : > { %v3548_v17 = vpop.permute.xlu0 %3547  ;;  %v3560_v18 = vunpack.i.h.bf16 %v3558_v15  ;;  %v3559_v19 = vunpack.i.l.bf16 %v3558_v15 }
  0x88   : > { %v3550_v20 = vunpack.i.h.bf16 %v3548_v17  ;;  %v3549_v21 = vunpack.i.l.bf16 %v3548_v17  ;;  %v204_v17 = vld [vmem:[%s4167_s1] sm:$0xff] }
  0x8a   : > { %v3563_v22 = vpop.permute.xlu1 %3562  ;;  %v245_v28 = vsel %vm240_vm1, %v3559_v19, %v3549_v21  ;;  %v246_v29 = vsel %vm240_vm1, %v3560_v18, %v3550_v20 }
  0x8b   : > { %v3553_v23 = vpop.permute.xlu0 %3552  ;;  %v3565_v26 = vunpack.i.h.bf16 %v3563_v22  ;;  %v3564_v27 = vunpack.i.l.bf16 %v3563_v22  ;;  %v3400_v42 = vpack.c.bf16 %v246_v29, %v245_v28 }
  0x8c   : > { %v3555_v24 = vunpack.i.h.bf16 %v3553_v23  ;;  %v3554_v25 = vunpack.i.l.bf16 %v3553_v23 }
  0x8e   : > { %v3573_v30 = vpop.permute.xlu1 %3572  ;;  %v243_v31 = vsel %vm240_vm1, %v3549_v21, %v3554_v25  ;;  %v244_v32 = vsel %vm240_vm1, %v3550_v20, %v3555_v24  ;;  %v241_v33 = vsel %vm240_vm1, %v3554_v25, %v3559_v19  ;;  %v242_v34 = vsel %vm240_vm1, %v3555_v24, %v3560_v18 }
  0x8f   : > { %v3575_v35 = vunpack.i.h.bf16 %v3573_v30  ;;  %v3574_v36 = vunpack.i.l.bf16 %v3573_v30  ;;  %v3568_v37 = vpop.permute.xlu0 %3567  ;;  %v3398_v38 = vpack.c.bf16 %v244_v32, %v243_v31  ;;  %v3403_v39 = vpack.c.bf16 %v242_v34, %v241_v33 }
  0x90   : > { %v3570_v40 = vunpack.i.h.bf16 %v3568_v37  ;;  %v3569_v41 = vunpack.i.l.bf16 %v3568_v37 }
  0x91   : > { %v224_v43 = vsel %vm219_vm2, %v3574_v36, %v3564_v27  ;;  %v225_v44 = vsel %vm219_vm2, %v3575_v35, %v3565_v26  ;;  %3399 = vmatprep.subr.bf16.mxu0 %v3398_v38  ;;  %3404 = vmatpush3.bf16.msra.mxu1 %v3403_v39  ;;  %v3196_v39 = vld [vmem:[%s4167_s1 + $0x10] sm:$0xff] }
  0x92   : > { %v3407_v46 = vpack.c.bf16 %v225_v44, %v224_v43  ;;  %v221_v47 = vsel %vm219_vm2, %v3570_v40, %v3575_v35  ;;  %v220_v48 = vsel %vm219_vm2, %v3569_v41, %v3574_v36  ;;  %3401 = vmatpush1.bf16.msra.mxu0 %v3400_v42  ;;  %v222_v49 = vsel %vm219_vm2, %v3564_v27, %v3569_v41  ;;  %v3583_v50 = vpop.permute.xlu1 %3582 }
  0x93   : > { %v3410_v51 = vpack.c.bf16 %v221_v47, %v220_v48  ;;  %v3578_v52 = vpop.permute.xlu0 %3577  ;;  %v223_v53 = vsel %vm219_vm2, %v3565_v26, %v3570_v40  ;;  %v3585_v54 = vunpack.i.h.bf16 %v3583_v50  ;;  %v3584_v55 = vunpack.i.l.bf16 %v3583_v50  ;;  %3409 = vmatprep.subr.bf16.mxu1 %v3674_v0  ;;  %v3199_v50 = vld [vmem:[%s4167_s1 + $0x18] sm:$0xff] }
  0x94   : > { %v3580_v56 = vunpack.i.h.bf16 %v3578_v52  ;;  %v3579_v57 = vunpack.i.l.bf16 %v3578_v52  ;;  %3295 = vmatmul.mubr.msk.f32.vlgmr.msra.gmra.mrb[0].mxu1 %vm247_vm3, %v3191_v45  ;;  %v3405_v58 = vpack.c.bf16 %v223_v53, %v222_v49 }
  0x95   : > { %3192 = vmatmul.mubr.msk.f32.vlgmr.msra.gmra.mrb[0].mxu0 %vm247_vm3, %v3191_v45  ;;  %3411 = vmatpush3.bf16.msra.mxu1 %v3410_v51 }
  0x96   : > { %3406 = vmatprep.subr.bf16.mxu0 %v3405_v58  ;;  %v3593_v59 = vpop.permute.xlu1 %3592  ;;  %3301 = vmatprep.mubr.msk.f32.mxu1 %vm3677_vm0, %v3678_v10  ;;  %v553_v60 = vsel %vm550_vm4, %v3579_v57, %v3584_v55  ;;  %v554_v61 = vsel %vm550_vm4, %v3580_v56, %v3585_v54 }
  0x97   : > { %3408 = vmatpush1.bf16.msra.mxu0 %v3407_v46  ;;  %v3588_v62 = vpop.permute.xlu0 %3587  ;;  %459 = vmatprep.mubr.f32.mxu0 %v3678_v10  ;;  %v3412_v63 = vpack.c.bf16 %v554_v61, %v553_v60  ;;  %v3595_v9 = vunpack.i.h.bf16 %v3593_v59  ;;  %v3594_v15 = vunpack.i.l.bf16 %v3593_v59 }
  0x98   : > { %v3590_v4 = vunpack.i.h.bf16 %v3588_v62  ;;  %v3589_v8 = vunpack.i.l.bf16 %v3588_v62  ;;  %3416 = vmatprep.subr.bf16.mxu1 %v3674_v0 }
  0x99   : > { %3413 = vmatprep.subr.bf16.mxu0 %v3412_v63 }
  0x9a   : > { %v552_v18 = vsel %vm550_vm4, %v3585_v54, %v3590_v4  ;;  %v551_v19 = vsel %vm550_vm4, %v3584_v55, %v3589_v8  ;;  %v555_v20 = vsel %vm550_vm4, %v3589_v8, %v3579_v57  ;;  %v556_v21 = vsel %vm550_vm4, %v3590_v4, %v3580_v56  ;;  %v3603_v22 = vpop.permute.xlu1 %3602 }
  0x9b   : > { %v3414_v23 = vpack.c.bf16 %v556_v21, %v555_v20  ;;  %v3417_v24 = vpack.c.bf16 %v552_v18, %v551_v19  ;;  %v3598_v25 = vpop.permute.xlu0 %3597  ;;  %v3605_v26 = vunpack.i.h.bf16 %v3603_v22  ;;  %v3604_v27 = vunpack.i.l.bf16 %v3603_v22 }
  0x9c   : > { %3302 = vmatmul.mubr.msk.f32.vlgmr.msra.gmra.mrb[0].mxu1 %vm247_vm3, %v204_v17  ;;  %v3600_v28 = vunpack.i.h.bf16 %v3598_v25  ;;  %v3599_v29 = vunpack.i.l.bf16 %v3598_v25 }
  0x9d   : > { %3194 = vmatmul.mubr.msk.f32.vlgmr.msra.gmra.mrb[0].mxu0 %vm247_vm3, %v204_v17  ;;  %3418 = vmatpush3.bf16.msra.mxu1 %v3417_v24  ;;  %v723_v32 = vsel %vm718_vm5, %v3604_v27, %v3594_v15  ;;  %v724_v33 = vsel %vm718_vm5, %v3605_v26, %v3595_v9 }
  0x9e   : > { %3415 = vmatpush1.bf16.msra.mxu0 %v3414_v23  ;;  %v719_v30 = vsel %vm718_vm5, %v3599_v29, %v3604_v27  ;;  %v720_v31 = vsel %vm718_vm5, %v3600_v28, %v3605_v26  ;;  %3308 = vmatprep.mubr.msk.f32.mxu1 %vm3677_vm0, %v3678_v10  ;;  %v721_v34 = vsel %vm718_vm5, %v3594_v15, %v3599_v29  ;;  %v3613_v40 = vpop.permute.xlu1 %3612  ;;  %v3205_v26 = vld [vmem:[%s4167_s1 + $0x28] sm:$0xff] }
  0x9f   : > { %624 = vmatprep.mubr.f32.mxu0 %v3678_v10  ;;  %v722_v35 = vsel %vm718_vm5, %v3595_v9, %v3600_v28  ;;  %3423 = vmatprep.subr.bf16.mxu1 %v3674_v0  ;;  %v3608_v36 = vpop.permute.xlu0 %3607  ;;  %v3424_v38 = vpack.c.bf16 %v720_v31, %v719_v30  ;;  %v3421_v41 = vpack.c.bf16 %v724_v33, %v723_v32  ;;  %v3615_v44 = vunpack.i.h.bf16 %v3613_v40 }
  0xa0   : > { %v3419_v37 = vpack.c.bf16 %v722_v35, %v721_v34  ;;  %v3610_v42 = vunpack.i.h.bf16 %v3608_v36  ;;  %v3609_v43 = vunpack.i.l.bf16 %v3608_v36  ;;  %v3614_v45 = vunpack.i.l.bf16 %v3613_v40 }
  0xa2   : > { %3420 = vmatprep.subr.bf16.mxu0 %v3419_v37  ;;  %v3623_v47 = vpop.permute.xlu1 %3622  ;;  %v1036_v48 = vsel %vm1035_vm6, %v3609_v43, %v3614_v45  ;;  %v1037_v49 = vsel %vm1035_vm6, %v3610_v42, %v3615_v44 }
  0xa3   : > { %v3618_v46 = vpop.permute.xlu0 %3617  ;;  %v3433_v54 = vpack.c.bf16 %v1037_v49, %v1036_v48  ;;  %v3625_v6 = vunpack.i.h.bf16 %v3623_v47  ;;  %v3624_v7 = vunpack.i.l.bf16 %v3623_v47 }
  0xa4   : > { %3309 = vmatmul.mubr.msk.f32.vlgmr.msra.gmra.mrb[0].mxu1 %vm247_vm3, %v3196_v39  ;;  %v3620_v52 = vunpack.i.h.bf16 %v3618_v46  ;;  %v3619_v53 = vunpack.i.l.bf16 %v3618_v46 }
  0xa5   : > { %3197 = vmatmul.mubr.msk.f32.vlgmr.msra.gmra.mrb[0].mxu0 %vm247_vm3, %v3196_v39  ;;  %3425 = vmatpush3.bf16.msra.mxu1 %v3424_v38 }
  0xa6   : > { %3422 = vmatpush1.bf16.msra.mxu0 %v3421_v41  ;;  %3315 = vmatprep.mubr.msk.f32.mxu1 %vm3677_vm0, %v3678_v10  ;;  %v3633_v56 = vpop.permute.xlu1 %3632  ;;  %v1041_v57 = vsel %vm1035_vm6, %v3615_v44, %v3620_v52  ;;  %v1040_v58 = vsel %vm1035_vm6, %v3614_v45, %v3619_v53  ;;  %v1038_v1 = vsel %vm1035_vm6, %v3619_v53, %v3609_v43  ;;  %v3208_v45 = vld [vmem:[%s4167_s1 + $0x30] sm:$0xff] }
  0xa7   : > { %792 = vmatprep.mubr.f32.mxu0 %v3678_v10  ;;  %3427 = vmatprep.subr.bf16.mxu0 %v3426_v11  ;;  %v3628_v51 = vpop.permute.xlu0 %3627  ;;  %v1039_v2 = vsel %vm1035_vm6, %v3620_v52, %v3610_v42  ;;  %v3438_v5 = vpack.c.bf16 %v1041_v57, %v1040_v58  ;;  %v3635_v62 = vunpack.i.h.bf16 %v3633_v56  ;;  %v3634_v63 = vunpack.i.l.bf16 %v3633_v56  ;;  %v1696_v56 = vld [vmem:[%s4169_s3] sm:$0x7] }
  0xa8   : > { %3430 = vmatprep.subr.bf16.mxu1 %v3674_v0  ;;  %v3630_v11 = vunpack.i.h.bf16 %v3628_v51  ;;  %v3629_v55 = vunpack.i.l.bf16 %v3628_v51  ;;  %v3435_v61 = vpack.c.bf16 %v1039_v2, %v1038_v1 }
  0xa9   : > { %v1206_v21 = vsel %vm1203_vm7, %v3634_v63, %v3624_v7  ;;  %v1207_v22 = vsel %vm1203_vm7, %v3635_v62, %v3625_v6 }
  0xaa   : > { %v1204_v59 = vsel %vm1203_vm7, %v3624_v7, %v3629_v55  ;;  %v1205_v3 = vsel %vm1203_vm7, %v3625_v6, %v3630_v11  ;;  %v3643_v60 = vpop.permute.xlu1 %3642  ;;  %v1208_v19 = vsel %vm1203_vm7, %v3629_v55, %v3634_v63  ;;  %v1209_v20 = vsel %vm1203_vm7, %v3630_v11, %v3635_v62  ;;  %v3211_v6 = vld [vmem:[%s4167_s1 + $0x38] sm:$0xff] }
  0xab   : > { %v3440_v4 = vpack.c.bf16 %v1205_v3, %v1204_v59  ;;  %v3645_v15 = vunpack.i.h.bf16 %v3643_v60  ;;  %v3644_v17 = vunpack.i.l.bf16 %v3643_v60  ;;  %v3445_v25 = vpack.c.bf16 %v1209_v20, %v1208_v19 }
  0xac   : > { %3316 = vmatmul.mubr.msk.f32.vlgmr.msra.gmra.mrb[0].mxu1 %vm247_vm3, %v3199_v50  ;;  %v3442_v28 = vpack.c.bf16 %v1207_v22, %v1206_v21  ;;  %v1699_v11 = vshrl.u32 %v217_v14, 7 }
  0xad   : > { %3200 = vmatmul.mubr.msk.f32.vlgmr.msra.gmra.mrb[0].mxu0 %vm247_vm3, %v3199_v50  ;;  %3432 = vmatpush3.bf16.msra.mxu1 %v3431_v13  ;;  %v3638_v13 = vpop.permute.xlu0 %3637 }
  0xae   : > { %3429 = vmatpush1.bf16.msra.mxu0 %v3428_v12  ;;  %3322 = vmatprep.mubr.msk.f32.mxu1 %vm3677_vm0, %v3678_v10  ;;  %v3202_v12 = vld [vmem:[%s4167_s1 + $0x20] sm:$0xff]  ;;  %v3640_v8 = vunpack.i.h.bf16 %v3638_v13  ;;  %v3639_v9 = vunpack.i.l.bf16 %v3638_v13  ;;  %v3653_v29 = vpop.permute.xlu1 %3652  ;;  %v1700_v55 = vsub.s32 0, %v1699_v11  ;;  %v1704_v57 = vsub.s32 1, %v1699_v11 }
  0xaf   : > { %941 = vmatprep.mubr.f32.mxu0 %v3678_v10  ;;  %3434 = vmatprep.subr.bf16.mxu0 %v3433_v54  ;;  %v3655_v33 = vunpack.i.h.bf16 %v3653_v29  ;;  %v3654_v34 = vunpack.i.l.bf16 %v3653_v29  ;;  %v1708_v1 = vsub.s32 2, %v1699_v11 }
  0xb0   : > { %3437 = vmatprep.subr.bf16.mxu1 %v3674_v0  ;;  %v1372_v23 = vsel %vm1371_vm8, %v3639_v9, %v3644_v17  ;;  %v1373_v24 = vsel %vm1371_vm8, %v3640_v8, %v3645_v15  ;;  %v1701_v2 = vrot.slane %v1696_v56, %v1700_v55  ;;  %v1705_v3 = vrot.slane %v1696_v56, %v1704_v57 }
  0xb1   : > { %v3648_v18 = vpop.permute.xlu0 %3647  ;;  %v3447_v32 = vpack.c.bf16 %v1373_v24, %v1372_v23  ;;  %v1709_v62 = vrot.slane %v1696_v56, %v1708_v1  ;;  %v3234_v56 = vld [vmem:[%s4168_s2 + $0x18] sm:$0xf] }
  0xb2   : > { %v3650_v30 = vunpack.i.h.bf16 %v3648_v18  ;;  %v3649_v31 = vunpack.i.l.bf16 %v3648_v18  ;;  %v3663_v41 = vpop.permute.xlu1 %3662  ;;  %v3217_v18 = vld [vmem:[%s4168_s2 + $0x4] sm:$0xf] }
  0xb3   : > { %v3665_v47 = vunpack.i.h.bf16 %v3663_v41  ;;  %v3664_v48 = vunpack.i.l.bf16 %v3663_v41 }
  0xb4   : > { %3323 = vmatmul.mubr.msk.f32.vlgmr.msra.gmra.mrb[0].mxu1 %vm247_vm3, %v3202_v12  ;;  %v1377_v37 = vsel %vm1371_vm8, %v3645_v15, %v3650_v30  ;;  %v1376_v38 = vsel %vm1371_vm8, %v3644_v17, %v3649_v31  ;;  %v1374_v39 = vsel %vm1371_vm8, %v3649_v31, %v3639_v9  ;;  %v1375_v40 = vsel %vm1371_vm8, %v3650_v30, %v3640_v8 }
  0xb5   : > { %3203 = vmatmul.mubr.msk.f32.vlgmr.msra.gmra.mrb[0].mxu0 %vm247_vm3, %v3202_v12  ;;  %3439 = vmatpush3.bf16.msra.mxu1 %v3438_v5  ;;  %v3658_v27 = vpop.permute.xlu0 %3657  ;;  %v3452_v44 = vpack.c.bf16 %v1377_v37, %v1376_v38  ;;  %v3449_v46 = vpack.c.bf16 %v1375_v40, %v1374_v39  ;;  %v1542_v52 = vsel %vm1539_vm9, %v3664_v48, %v3654_v34 }
  0xb6   : > { %3436 = vmatpush1.bf16.msra.mxu0 %v3435_v61  ;;  %3329 = vmatprep.mubr.msk.f32.mxu1 %vm3677_vm0, %v3678_v10  ;;  %v3660_v35 = vunpack.i.h.bf16 %v3658_v27  ;;  %v3659_v36 = vunpack.i.l.bf16 %v3658_v27  ;;  %v1543_v53 = vsel %vm1539_vm9, %v3665_v47, %v3655_v33 }
  0xb7   : > { %1109 = vmatprep.mubr.f32.mxu0 %v3678_v10  ;;  %3441 = vmatprep.subr.bf16.mxu0 %v3440_v4  ;;  %v3456_v7 = vpack.c.bf16 %v1543_v53, %v1542_v52 }
  0xb8   : > { %3444 = vmatprep.subr.bf16.mxu1 %v3674_v0  ;;  %v1540_v42 = vsel %vm1539_vm9, %v3654_v34, %v3659_v36  ;;  %v1541_v43 = vsel %vm1539_vm9, %v3655_v33, %v3660_v35  ;;  %v1544_v50 = vsel %vm1539_vm9, %v3659_v36, %v3664_v48  ;;  %v1545_v51 = vsel %vm1539_vm9, %v3660_v35, %v3665_v47  ;;  %v3222_v36 = vld [vmem:[%s4168_s2 + $0x8] sm:$0xf]  ;;  %v3228_v48 = vld [vmem:[%s4168_s2 + $0x10] sm:$0xf] }
  0xb9   : > { %v3454_v49 = vpack.c.bf16 %v1541_v43, %v1540_v42  ;;  %v3459_v54 = vpack.c.bf16 %v1545_v51, %v1544_v50  ;;  %v3225_v43 = vld [vmem:[%s4168_s2 + $0xc] sm:$0xf] }
  0xbc   : > { %3330 = vmatmul.mubr.msk.f32.vlgmr.msra.gmra.mrb[0].mxu1 %vm247_vm3, %v3205_v26 }
  0xbd   : > { %3206 = vmatmul.mubr.msk.f32.vlgmr.msra.gmra.mrb[0].mxu0 %vm247_vm3, %v3205_v26  ;;  %3446 = vmatpush3.bf16.msra.mxu1 %v3445_v25 }
  0xbe   : > { %3443 = vmatpush1.bf16.msra.mxu0 %v3442_v28  ;;  %3336 = vmatprep.mubr.msk.f32.mxu1 %vm3677_vm0, %v3678_v10  ;;  %v1716_v28 = vld [vmem:[%s4168_s2] sm:$0xf] }
  0xbf   : > { %1277 = vmatprep.mubr.f32.mxu0 %v3678_v10  ;;  %3448 = vmatprep.subr.bf16.mxu0 %v3447_v32 }
  0xc0   : > { %3451 = vmatprep.subr.bf16.mxu1 %v3674_v0 }
  0xc4   : > { %3337 = vmatmul.mubr.msk.f32.vlgmr.msra.gmra.mrb[0].mxu1 %vm247_vm3, %v3208_v45 }
  0xc5   : > { %3209 = vmatmul.mubr.msk.f32.vlgmr.msra.gmra.mrb[0].mxu0 %vm247_vm3, %v3208_v45  ;;  %3453 = vmatpush3.bf16.msra.mxu1 %v3452_v44 }
  0xc6   : > { %3450 = vmatpush1.bf16.msra.mxu0 %v3449_v46  ;;  %3343 = vmatprep.mubr.msk.f32.mxu1 %vm3677_vm0, %v3678_v10 }
  0xc7   : > { %1445 = vmatprep.mubr.f32.mxu0 %v3678_v10  ;;  %3455 = vmatprep.subr.bf16.mxu0 %v3454_v49 }
  0xc8   : > { %3458 = vmatprep.subr.bf16.mxu1 %v3674_v0  ;;  %v3214_v0 = vld [vmem:[%s4167_s1 + $0x40] sm:$0xff] }
  0xcc   : > { %3344 = vmatmul.mubr.msk.f32.vlgmr.msra.gmra.mrb[0].mxu1 %vm247_vm3, %v3211_v6 }
  0xcd   : > { %3212 = vmatmul.mubr.msk.f32.vlgmr.msra.gmra.mrb[0].mxu0 %vm247_vm3, %v3211_v6  ;;  %3460 = vmatpush3.bf16.msra.mxu1 %v3459_v54  ;;  %v3231_v54 = vld [vmem:[%s4168_s2 + $0x14] sm:$0xf] }
  0xce   : > { %3457 = vmatpush1.bf16.msra.mxu0 %v3456_v7  ;;  %3350 = vmatprep.mubr.msk.f32.mxu1 %vm3677_vm0, %v3678_v10 }
  0xcf   : > { %1613 = vmatprep.mubr.f32.mxu0 %v3678_v10  ;;  %3353 = vmatprep.subr.mxu1 %v3678_v10 }
  0xd4   : > { %3351 = vmatmul.mubr.msk.f32.vlgmr.msra.gmra.mrb[0].mxu1 %vm247_vm3, %v3214_v0 }
  0xd5   : > { %3215 = vmatmul.mubr.msk.f32.vlgmr.msra.gmra.mrb[0].mxu0 %vm247_vm3, %v3214_v0  ;;  %3355 = vmatprep.mubr.msk.f32.mxu1 %vm3677_vm0, %v3678_v10 }
  0xd6   : > { %1805 = vmatprep.mubr.f32.mxu0 %v3678_v10 }
 0x1a7   : > { %v1686_v58 = vpop.f32.mrb[0].mxu1 }
 0x1a8   : > { %v1615_v13 = vpop.f32.mrb[0].mxu0  ;;  %v3352_v59 = vpop.f32.mrb[1].mxu1  ;;  %v1695_v61 = vmax.f32 %v1686_v58, 0.0 }
 0x1a9   : > { %v1693_v5 = vmax.f32 %v1615_v13, 0.0  ;;  %v1617_v12 = vpop.f32.mrb[1].mxu0 }
 0x1aa   : > { %v1694_v60 = vmax.f32 %v1617_v12, 0.0  ;;  %v3985_v4 = vmul.f32 %v1709_v62, %v1695_v61 }
 0x1ab   : > { %v3977_v63 = vmul.f32 %v1701_v2, %v1693_v5 }
 0x1ac   : > { %v3979_v14 = vmul.f32 %v1705_v3, %v1694_v60  ;;  %v3237_v3 = vld [vmem:[%s4168_s2 + $0x1c] sm:$0xf]  ;;  %v3240_v60 = vld [vmem:[%s4168_s2 + $0x20] sm:$0xf] }
 0x1ad   : > { %1728 = vrot.lane.b32.xlu0 %v3977_v63, %s3675_s21 }
 0x1ae   : > { %1730 = vrot.lane.b32.xlu1 %v3979_v14, %s3675_s21 }
 0x1b1   : > { %1732 = vrot.lane.b32.xlu0 %v3985_v4, %s3675_s21 }
 0x1b2   : > { %1717 = vrot.lane.b32.xlu1 %v3977_v63, %s3676_s22 }
 0x1b5   : > { %1719 = vrot.lane.b32.xlu0 %v3979_v14, %s3676_s22 }
 0x1b6   : > { %1721 = vrot.lane.b32.xlu1 %v3985_v4, %s3676_s22 }
 0x1b9   : > { %2028 = vrot.lane.b32.xlu0 %v3977_v63, %s3679_s23 }
 0x1ba   : > { %2030 = vrot.lane.b32.xlu1 %v3979_v14, %s3679_s23 }
 0x1bd   : > { %2032 = vrot.lane.b32.xlu0 %v3985_v4, %s3679_s23 }
 0x1be   : > { %2186 = vrot.lane.b32.xlu1 %v3977_v63, %s3680_s24 }
 0x1c1   : > { %2188 = vrot.lane.b32.xlu0 %v3979_v14, %s3680_s24 }
 0x1c2   : > { %2190 = vrot.lane.b32.xlu1 %v3985_v4, %s3680_s24 }
 0x1c5   : > { %2495 = vrot.lane.b32.xlu0 %v3979_v14, %s3681_s25 }
 0x1c6   : > { %2497 = vrot.lane.b32.xlu1 %v3985_v4, %s3681_s25 }
 0x1c9   : > { %2493 = vrot.lane.b32.xlu0 %v3977_v63, %s3681_s25 }
 0x1ca   : > { %2653 = vrot.lane.b32.xlu1 %v3979_v14, %s3682_s26 }
 0x1cd   : > { %2655 = vrot.lane.b32.xlu0 %v3985_v4, %s3682_s26 }
 0x1ce   : > { %2651 = vrot.lane.b32.xlu1 %v3977_v63, %s3682_s26 }
 0x1d1   : > { %2811 = vrot.lane.b32.xlu0 %v3979_v14, %s3683_s27 }
 0x1d2   : > { %2813 = vrot.lane.b32.xlu1 %v3985_v4, %s3683_s27 }
 0x1d5   : > { %2809 = vrot.lane.b32.xlu0 %v3977_v63, %s3683_s27 }
 0x1d6   : > { %2969 = vrot.lane.b32.xlu1 %v3979_v14, %s3684_s28 }
 0x1d9   : > { %2971 = vrot.lane.b32.xlu0 %v3985_v4, %s3684_s28 }
 0x1da   : > { %2967 = vrot.lane.b32.xlu1 %v3977_v63, %s3684_s28 }
 0x21f   : > { %v1729_v8 = vpop.permute.xlu0 %1728 }
 0x220   : > { %v1731_v9 = vpop.permute.xlu1 %1730 }
 0x221   : > { %v1735_v15 = vsel %vm240_vm1, %v1729_v8, %v1731_v9 }
 0x222   : > { %1741 = vmatprep.subr.mxu0 %v1735_v15 }
 0x223   : > { %v1733_v17 = vpop.permute.xlu0 %1732 }
 0x224   : > { %v1734_v19 = vsel %vm240_vm1, %v1731_v9, %v1733_v17  ;;  %v1736_v20 = vsel %vm240_vm1, %v1733_v17, %v1729_v8  ;;  %v1718_v21 = vpop.permute.xlu1 %1717 }
 0x225   : > { %1742 = vmatpush1.msra.mxu0 %v1736_v20  ;;  %3354 = vmatpush3.msra.mxu1 %v1734_v19 }
 0x226   : > { %3218 = vmatmul.mubr.msk.f32.vlgmr.msra.gmra.mrb[2].mxu0 %vm1737_vm10, %v3217_v18  ;;  %3356 = vmatmul.mubr.msk.f32.vlgmr.msra.gmra.mrb[2].mxu1 %vm1737_vm10, %v3217_v18 }
 0x227   : > { %v1720_v22 = vpop.permute.xlu0 %1719  ;;  %3358 = vmatprep.subr.mxu1 %v3678_v10  ;;  %1949 = vmatprep.mubr.f32.mxu0 %v3678_v10 }
 0x228   : > { %v1722_v23 = vpop.permute.xlu1 %1721  ;;  %v1724_v24 = vsel %vm219_vm2, %v1718_v21, %v1720_v22  ;;  %3360 = vmatprep.mubr.msk.f32.mxu1 %vm3677_vm0, %v3678_v10 }
 0x229   : > { %v1723_v25 = vsel %vm219_vm2, %v1720_v22, %v1722_v23  ;;  %v1725_v26 = vsel %vm219_vm2, %v1722_v23, %v1718_v21  ;;  %1885 = vmatprep.subr.mxu0 %v1724_v24 }
 0x22a   : > { %1886 = vmatpush1.msra.mxu0 %v1725_v26  ;;  %3359 = vmatpush3.msra.mxu1 %v1723_v25 }
 0x22b   : > { %v2029_v27 = vpop.permute.xlu0 %2028  ;;  %3363 = vmatprep.subr.mxu1 %v3678_v10 }
 0x22c   : > { %v2031_v29 = vpop.permute.xlu1 %2030 }
 0x22d   : > { %v2035_v30 = vsel %vm550_vm4, %v2029_v27, %v2031_v29 }
 0x22e   : > { %3220 = vmatmul.mubr.msk.f32.vlgmr.msra.gmra.mrb[2].mxu0 %vm1737_vm10, %v1716_v28  ;;  %3361 = vmatmul.mubr.msk.f32.vlgmr.msra.gmra.mrb[2].mxu1 %vm1737_vm10, %v1716_v28 }
 0x22f   : > { %2040 = vmatprep.subr.mxu0 %v2035_v30  ;;  %v2033_v31 = vpop.permute.xlu0 %2032  ;;  %2104 = vmatprep.mubr.f32.mxu0 %v3678_v10 }
 0x230   : > { %v2034_v32 = vsel %vm550_vm4, %v2031_v29, %v2033_v31  ;;  %v2036_v33 = vsel %vm550_vm4, %v2033_v31, %v2029_v27  ;;  %v2187_v34 = vpop.permute.xlu1 %2186  ;;  %3365 = vmatprep.mubr.msk.f32.mxu1 %vm3677_vm0, %v3678_v10 }
 0x231   : > { %2041 = vmatpush1.msra.mxu0 %v2036_v33  ;;  %3364 = vmatpush3.msra.mxu1 %v2034_v32 }
 0x232   : > { %3368 = vmatprep.subr.mxu1 %v3678_v10 }
 0x233   : > { %v2189_v35 = vpop.permute.xlu0 %2188 }
 0x234   : > { %v2191_v37 = vpop.permute.xlu1 %2190  ;;  %v2193_v38 = vsel %vm718_vm5, %v2187_v34, %v2189_v35 }
 0x235   : > { %v2192_v39 = vsel %vm718_vm5, %v2189_v35, %v2191_v37  ;;  %v2194_v40 = vsel %vm718_vm5, %v2191_v37, %v2187_v34  ;;  %2198 = vmatprep.subr.mxu0 %v2193_v38 }
 0x236   : > { %3223 = vmatmul.mubr.msk.f32.vlgmr.msra.gmra.mrb[2].mxu0 %vm1737_vm10, %v3222_v36  ;;  %3366 = vmatmul.mubr.msk.f32.vlgmr.msra.gmra.mrb[2].mxu1 %vm1737_vm10, %v3222_v36 }
 0x237   : > { %2199 = vmatpush1.msra.mxu0 %v2194_v40  ;;  %3369 = vmatpush3.msra.mxu1 %v2192_v39  ;;  %v2496_v41 = vpop.permute.xlu0 %2495 }
 0x238   : > { %2347 = vmatprep.subr.mxu0 %v3979_v14  ;;  %2262 = vmatprep.mubr.f32.mxu0 %v3678_v10  ;;  %v2498_v42 = vpop.permute.xlu1 %2497 }
 0x239   : > { %3370 = vmatprep.mubr.msk.f32.mxu1 %vm3677_vm0, %v3678_v10  ;;  %3373 = vmatprep.subr.mxu1 %v3678_v10  ;;  %v2499_v45 = vsel %vm1035_vm6, %v2496_v41, %v2498_v42 }
 0x23b   : > { %v2494_v44 = vpop.permute.xlu0 %2493 }
 0x23c   : > { %v2654_v46 = vpop.permute.xlu1 %2653  ;;  %v2500_v49 = vsel %vm1035_vm6, %v2494_v44, %v2496_v41  ;;  %v2501_v50 = vsel %vm1035_vm6, %v2498_v42, %v2494_v44 }
 0x23e   : > { %3226 = vmatmul.mubr.msk.f32.vlgmr.msra.gmra.mrb[2].mxu0 %vm1737_vm10, %v3225_v43  ;;  %3371 = vmatmul.mubr.msk.f32.vlgmr.msra.gmra.mrb[2].mxu1 %vm1737_vm10, %v3225_v43 }
 0x23f   : > { %2348 = vmatpush1.msra.mxu0 %v3977_v63  ;;  %3374 = vmatpush3.msra.mxu1 %v3985_v4  ;;  %v2656_v47 = vpop.permute.xlu0 %2655 }
 0x240   : > { %2505 = vmatprep.subr.mxu0 %v2499_v45  ;;  %2411 = vmatprep.mubr.f32.mxu0 %v3678_v10  ;;  %v2652_v51 = vpop.permute.xlu1 %2651  ;;  %v2657_v52 = vsel %vm1203_vm7, %v2654_v46, %v2656_v47 }
 0x241   : > { %3375 = vmatprep.mubr.msk.f32.mxu1 %vm3677_vm0, %v3678_v10  ;;  %3378 = vmatprep.subr.mxu1 %v3678_v10  ;;  %v2658_v7 = vsel %vm1203_vm7, %v2652_v51, %v2654_v46  ;;  %v2659_v0 = vsel %vm1203_vm7, %v2656_v47, %v2652_v51 }
 0x243   : > { %v2812_v53 = vpop.permute.xlu0 %2811 }
 0x244   : > { %v2814_v6 = vpop.permute.xlu1 %2813 }
 0x245   : > { %v2815_v55 = vsel %vm1371_vm8, %v2812_v53, %v2814_v6 }
 0x246   : > { %3229 = vmatmul.mubr.msk.f32.vlgmr.msra.gmra.mrb[2].mxu0 %vm1737_vm10, %v3228_v48  ;;  %3376 = vmatmul.mubr.msk.f32.vlgmr.msra.gmra.mrb[2].mxu1 %vm1737_vm10, %v3228_v48 }
 0x247   : > { %2506 = vmatpush1.msra.mxu0 %v2500_v49  ;;  %3379 = vmatpush3.msra.mxu1 %v2501_v50  ;;  %v2810_v11 = vpop.permute.xlu0 %2809 }
 0x248   : > { %2663 = vmatprep.subr.mxu0 %v2657_v52  ;;  %2569 = vmatprep.mubr.f32.mxu0 %v3678_v10  ;;  %v2970_v58 = vpop.permute.xlu1 %2969  ;;  %v2816_v1 = vsel %vm1371_vm8, %v2810_v11, %v2812_v53  ;;  %v2817_v2 = vsel %vm1371_vm8, %v2814_v6, %v2810_v11 }
 0x249   : > { %3380 = vmatprep.mubr.msk.f32.mxu1 %vm3677_vm0, %v3678_v10  ;;  %3383 = vmatprep.subr.mxu1 %v3678_v10 }
 0x24b   : > { %v2972_v57 = vpop.permute.xlu0 %2971 }
 0x24c   : > { %v2973_v13 = vsel %vm1539_vm9, %v2970_v58, %v2972_v57  ;;  %v2968_v59 = vpop.permute.xlu1 %2967 }
 0x24d   : > { %v2974_v5 = vsel %vm1539_vm9, %v2968_v59, %v2970_v58  ;;  %v2975_v12 = vsel %vm1539_vm9, %v2972_v57, %v2968_v59 }
 0x24e   : > { %3232 = vmatmul.mubr.msk.f32.vlgmr.msra.gmra.mrb[2].mxu0 %vm1737_vm10, %v3231_v54  ;;  %3381 = vmatmul.mubr.msk.f32.vlgmr.msra.gmra.mrb[2].mxu1 %vm1737_vm10, %v3231_v54 }
 0x24f   : > { %2664 = vmatpush1.msra.mxu0 %v2658_v7  ;;  %3384 = vmatpush3.msra.mxu1 %v2659_v0 }
 0x250   : > { %2821 = vmatprep.subr.mxu0 %v2815_v55  ;;  %2727 = vmatprep.mubr.f32.mxu0 %v3678_v10 }
 0x251   : > { %3385 = vmatprep.mubr.msk.f32.mxu1 %vm3677_vm0, %v3678_v10  ;;  %3388 = vmatprep.subr.mxu1 %v3678_v10 }
 0x256   : > { %3235 = vmatmul.mubr.msk.f32.vlgmr.msra.gmra.mrb[2].mxu0 %vm1737_vm10, %v3234_v56  ;;  %3386 = vmatmul.mubr.msk.f32.vlgmr.msra.gmra.mrb[2].mxu1 %vm1737_vm10, %v3234_v56 }
 0x257   : > { %2822 = vmatpush1.msra.mxu0 %v2816_v1  ;;  %3389 = vmatpush3.msra.mxu1 %v2817_v2 }
 0x258   : > { %2979 = vmatprep.subr.mxu0 %v2973_v13  ;;  %2885 = vmatprep.mubr.f32.mxu0 %v3678_v10 }
 0x259   : > { %3390 = vmatprep.mubr.msk.f32.mxu1 %vm3677_vm0, %v3678_v10  ;;  %3393 = vmatprep.subr.mxu1 %v3678_v10 }
 0x25e   : > { %3238 = vmatmul.mubr.msk.f32.vlgmr.msra.gmra.mrb[2].mxu0 %vm1737_vm10, %v3237_v3  ;;  %3391 = vmatmul.mubr.msk.f32.vlgmr.msra.gmra.mrb[2].mxu1 %vm1737_vm10, %v3237_v3 }
 0x25f   : > { %2980 = vmatpush1.msra.mxu0 %v2974_v5  ;;  %3394 = vmatpush3.msra.mxu1 %v2975_v12 }
 0x260   : > { %3043 = vmatprep.mubr.f32.mxu0 %v3678_v10  ;;  %3395 = vmatprep.mubr.msk.f32.mxu1 %vm3677_vm0, %v3678_v10 }
 0x266   : > { %3241 = vmatmul.mubr.msk.f32.vlgmr.msra.gmra.mrb[2].mxu0 %vm1737_vm10, %v3240_v60  ;;  %3396 = vmatmul.mubr.msk.f32.vlgmr.msra.gmra.mrb[2].mxu1 %vm1737_vm10, %v3240_v60 }
 0x339   : > { %v3045_v16 = vpop.f32.mrb[2].mxu0  ;;  %v3116_v61 = vpop.f32.mrb[2].mxu1 }
 0x33a   : > { %3128 = vst [vmem:[%s197_s30 + $0x8] sm:$0xf] %v3116_v61  ;;  %v3047_v62 = vpop.f32.mrb[3].mxu0  ;;  %v3397_v63 = vpop.f32.mrb[3].mxu1 }
 0x33b   : > { %v3125_v14 = vcombine.low %v3045_v16, %v3047_v62 }
 0x33d   : > { %3127 = vst [vmem:[%s197_s30] sm:$0xff] %v3125_v14 }
 0x33e PF: > { %s14_s15 = sadd.s32 1, %s3672_s15  }
 0x33f   : > { %p11_p4 = scmp.ge.s32.totalorder %s14_s15, 4  }
 0x341   :  { %13 = sbr.rel (!%p11_p4) target bundleno = 1 (0x1), region = 82 }

</bundles_post_ra>
